<compile_context>
chip_gen: v7x
topology: tpu7x:2x2x1
jax: 0.10.0
libtpu: 0.0.40
codegen_flags: <defaults>
</compile_context>

<pallas_src>
import functools

import jax
import jax.numpy as jnp
from jax.experimental import pallas as pl
from jax.experimental.pallas import tpu as pltpu

_LANES = 128


def _cdiv(a, b):
    return -(-a // b)


def _default_num_splits():
    # v7x has 2 TensorCores per chip: an extra "parallel" grid axis gives TC1
    # work even when B == 1.  On single-TC chips (v5e/v6e) it is overhead.
    try:
        kind = jax.devices()[0].device_kind.lower()
    except Exception:
        return 1
    return 2 if ("v7" in kind or "7x" in kind) else 1


def _dice_ce_kernel(x_ref, y_ref, stats_ref, ce_ref, *,
                    n_valid, tiles_per_split, needs_mask, n_classes):
    # x_ref:     (1, C, TR, 128) logits (any float dtype)
    # y_ref:     (1, 1, TR, 128) int8 labels
    # stats_ref: (1, 3, C, 128) f32 accumulator: [tp, sum(p), count] partials
    # ce_ref:    (1, TR, 128) bf16 per-voxel cross-entropy (-inf on tail voxels)
    sp = pl.program_id(1)
    ni = pl.program_id(2)

    @pl.when(ni == 0)
    def _init():
        stats_ref[...] = jnp.zeros_like(stats_ref)

    C = n_classes
    TR = x_ref.shape[2]

    lab = y_ref[0, 0, :, :].astype(jnp.int32)                  # (TR, 128)

    if needs_mask:
        row_off = (sp * tiles_per_split + ni) * TR
        rows = jax.lax.broadcasted_iota(jnp.int32, (TR, _LANES), 0) + row_off
        lanes = jax.lax.broadcasted_iota(jnp.int32, (TR, _LANES), 1)
        valid = rows * _LANES + lanes < n_valid
        lab = jnp.where(valid, lab, -1)                        # no class matches
    else:
        valid = None

    # Pass 1: channel max (re-load x per channel; no xs list kept live).
    m = x_ref[0, 0, :, :].astype(jnp.float32)
    for c in range(1, C):
        m = jnp.maximum(m, x_ref[0, c, :, :].astype(jnp.float32))

    zero = jnp.zeros((TR, _LANES), jnp.float32)
    one = jnp.ones((TR, _LANES), jnp.float32)

    # Pass 2: exp / sum / target-logit (select chain, no one-hot multiplies).
    logit_t = zero
    es = []
    s = None
    for c in range(C):
        x_c = x_ref[0, c, :, :].astype(jnp.float32)
        e_c = jnp.exp(x_c - m)                                 # EUP
        es.append(e_c)
        s = e_c if s is None else s + e_c
        logit_t = jnp.where(lab == c, x_c, logit_t)

    # Softmax denominator: approx EUP reciprocal + one Newton step (the stats
    # path accumulates over all voxels, so keep it near-exact).
    inv_s = pl.reciprocal(s, approx=True)
    inv_s = inv_s * (2.0 - s * inv_s)
    lse = m + jnp.log(s)                                       # logsumexp

    # Pass 3: per-channel dice statistics (row sums keep lanes dense).
    tp_rows, ps_rows, cnt_rows = [], [], []
    for c in range(C):
        eq = lab == c
        p_c = es[c] * inv_s
        if needs_mask:
            p_c = jnp.where(valid, p_c, 0.0)                   # kills garbage/NaN
        tp_rows.append(jnp.sum(jnp.where(eq, p_c, zero), axis=0, keepdims=True))
        ps_rows.append(jnp.sum(p_c, axis=0, keepdims=True))
        cnt_rows.append(jnp.sum(jnp.where(eq, one, zero), axis=0, keepdims=True))

    stats_ref[0, 0, :, :] += jnp.concatenate(tp_rows, axis=0)   # tp      (C, 128)
    stats_ref[0, 1, :, :] += jnp.concatenate(ps_rows, axis=0)   # sum(p)  (C, 128)
    stats_ref[0, 2, :, :] += jnp.concatenate(cnt_rows, axis=0)  # count   (C, 128)

    # Per-voxel cross-entropy: logsumexp - logit[target]; tail voxels -> -inf.
    ce = lse - logit_t
    if needs_mask:
        ce = jnp.where(valid, ce, -jnp.inf)
    ce_ref[0, :, :] = ce.astype(ce_ref.dtype)


def dc_and_topk_loss(net_output, target, *, smooth=1.0, batch_dice=False,
                     do_bg=True, square=False, k=10,
                     tile_rows=512, num_splits=None):
    """Equivalent of DC_and_topk_loss({}, {}, aggregate='sum')(net_output, target)."""
    assert not square  # SoftDiceLoss default (square=False)

    B, C = net_output.shape[0], net_output.shape[1]
    N = 1
    for d in net_output.shape[2:]:
        N *= d

    x = net_output.reshape(B, C, N)
    if not jnp.issubdtype(x.dtype, jnp.floating):
        x = x.astype(jnp.float32)
    # Class ids fit int8 for any realistic nnU-Net label map (C < 128).
    y = target.reshape(B, 1, N).astype(jnp.int8)

    R = _cdiv(N, _LANES)
    lane_pad = R * _LANES - N
    if lane_pad:
        # Only needed when N is not a multiple of 128 (<= 127 elements).
        x = jnp.pad(x, ((0, 0), (0, 0), (0, lane_pad)))
        y = jnp.pad(y, ((0, 0), (0, 0), (0, lane_pad)))
    x = x.reshape(B, C, R, _LANES)
    y = y.reshape(B, 1, R, _LANES)

    # Row tiling: multiple of 32 (int8 sublane tile is (32,128)) when tiled,
    # full extent otherwise.
    tr_cap = max(32, (tile_rows // 32) * 32)
    tr = R if R <= tr_cap else tr_cap
    n_tiles = _cdiv(R, tr)

    if num_splits is None:
        num_splits = _default_num_splits()
    S = num_splits if (num_splits > 1 and n_tiles % num_splits == 0) else 1
    tps = n_tiles // S

    # Masking only compiled in when the grid over-covers the real voxel count.
    needs_mask = (n_tiles * tr * _LANES != N)

    kernel = functools.partial(
        _dice_ce_kernel, n_valid=N, tiles_per_split=tps,
        needs_mask=needs_mask, n_classes=C)

    stats, ce = pl.pallas_call(
        kernel,
        out_shape=(
            jax.ShapeDtypeStruct((B * S, 3, C, _LANES), jnp.float32),
            jax.ShapeDtypeStruct((B, R, _LANES), jnp.bfloat16),
        ),
        grid_spec=pltpu.PrefetchScalarGridSpec(
            num_scalar_prefetch=0,
            grid=(B, S, tps),
            in_specs=[
                pl.BlockSpec((1, C, tr, _LANES),
                             lambda b, sp, ni: (b, 0, sp * tps + ni, 0)),
                pl.BlockSpec((1, 1, tr, _LANES),
                             lambda b, sp, ni: (b, 0, sp * tps + ni, 0)),
            ],
            out_specs=[
                # Stats block is constant across the reduction (ni) axis ->
                # resident in VMEM, acts as the accumulator.
                pl.BlockSpec((1, 3, C, _LANES),
                             lambda b, sp, ni: (b * S + sp, 0, 0, 0)),
                pl.BlockSpec((1, tr, _LANES),
                             lambda b, sp, ni: (b, sp * tps + ni, 0)),
            ],
        ),
        compiler_params=pltpu.CompilerParams(
            dimension_semantics=("parallel", "parallel", "arbitrary"),
            vmem_limit_bytes=32 * 1024 * 1024,
        ),
    )(x, y)

    # ---- SoftDiceLoss epilogue (tiny (B, C) math) ----
    stats = stats.reshape(B, S, 3, C, _LANES).sum(axis=(1, 4))   # (B, 3, C)
    tp = stats[:, 0]
    fp = stats[:, 1] - tp          # sum(p)  - tp
    fn = stats[:, 2] - tp          # count   - tp

    if batch_dice:                 # axes = [0] + spatial
        tp = tp.sum(axis=0)
        fp = fp.sum(axis=0)
        fn = fn.sum(axis=0)
    dc = (2.0 * tp + smooth) / (2.0 * tp + fp + fn + smooth)
    dc = 1.0 - dc
    if not do_bg:
        dc = dc[1:] if batch_dice else dc[:, 1:]
    dc_loss = dc.mean()

    # ---- TopKLoss epilogue ----
    # Tail voxels hold -inf, so top_k can run directly on the kernel output.
    ce_flat = ce.reshape(-1)
    n_topk = max(1, int(B * N * k / 100))
    topk_vals = jax.lax.top_k(ce_flat, n_topk)[0]
    ce_loss = topk_vals.astype(jnp.float32).mean()

    # aggregate == 'sum'
    return ce_loss + dc_loss


def _reference(net_output, target, *, smooth=1.0, k=10):
    """Pure-JAX reference of DC_and_topk_loss (defaults)."""
    B, C = net_output.shape[0], net_output.shape[1]
    xf = net_output.astype(jnp.float32)
    p = jax.nn.softmax(xf, axis=1)
    ch = jnp.arange(C).reshape((1, C) + (1,) * (net_output.ndim - 2))
    onehot = (target.astype(jnp.int32) == ch).astype(jnp.float32)
    axes = tuple(range(2, net_output.ndim))
    tp = (p * onehot).sum(axes)
    fp = (p * (1.0 - onehot)).sum(axes)
    fn = ((1.0 - p) * onehot).sum(axes)
    dc = 1.0 - (2.0 * tp + smooth) / (2.0 * tp + fp + fn + smooth)
    dc_loss = dc.mean()
    logp = jax.nn.log_softmax(xf, axis=1)
    ce = -jnp.take_along_axis(logp, target.astype(jnp.int32), axis=1)
    ce_flat = ce.reshape(-1)
    n_topk = max(1, int(ce_flat.shape[0] * k / 100))
    ce_loss = jax.lax.top_k(ce_flat, n_topk)[0].mean()
    return ce_loss + dc_loss


if __name__ == "__main__":
    key = jax.random.PRNGKey(0)
    kx, ky = jax.random.split(key)
    B, C, H, W = 2, 4, 16, 16
    net_output = jax.random.normal(kx, (B, C, H, W), dtype=jnp.float32)
    target = jax.random.randint(ky, (B, 1, H, W), 0, C, dtype=jnp.int32)

    loss = dc_and_topk_loss(net_output, target)
    loss = jax.block_until_ready(loss)

    ref = jax.block_until_ready(_reference(net_output, target))
    assert loss.shape == () and jnp.isfinite(loss)
    assert jnp.allclose(loss, ref, rtol=2e-2, atol=2e-2), (loss, ref)
    print("KERNEL_OK")
</pallas_src>

<mosaic_0001>
module attributes {stable_mosaic.version = 11 : i64} {
  func.func @_dice_ce_kernel(%arg0: i32, %arg1: i32, %arg2: i32, %arg3: memref<1x4x2x128xf32, #tpu.memory_space<vmem>>, %arg4: memref<1x1x2x128xi8, #tpu.memory_space<vmem>>, %arg5: memref<1x3x4x128xf32, #tpu.memory_space<vmem>>, %arg6: memref<1x2x128xbf16, #tpu.memory_space<vmem>>) attributes {dimension_semantics = [#tpu.dimension_semantics<parallel>, #tpu.dimension_semantics<parallel>, #tpu.dimension_semantics<arbitrary>], iteration_bounds = array<i64: 2, 1, 1>, scalar_prefetch = 0 : i64, scratch_operands = 0 : i64, tpu.core_type = #tpu.core_type<tc>, window_params = [{transform_indices = @transform_0, window_bounds = array<i64: 1, 4, 2, 128>}, {transform_indices = @transform_1, window_bounds = array<i64: 1, 1, 2, 128>}, {transform_indices = @transform_2, window_bounds = array<i64: 1, 3, 4, 128>}, {transform_indices = @transform_3, window_bounds = array<i64: 1, 2, 128>}]} {
    %c0_i32 = arith.constant 0 : i32
    %0 = arith.cmpi eq, %arg2, %c0_i32 : i32
    %1 = arith.extui %0 : i1 to i32
    %c0_i32_0 = arith.constant 0 : i32
    %2 = arith.cmpi ne, %1, %c0_i32_0 : i32
    scf.if %2 {
      %cst_79 = arith.constant 0.000000e+00 : f32
      %127 = vector.broadcast %cst_79 : f32 to vector<1x3x4x128xf32>
      %c0_80 = arith.constant 0 : index
      %c0_81 = arith.constant 0 : index
      %c0_82 = arith.constant 0 : index
      %c0_83 = arith.constant 0 : index
      %128 = vector.load %arg5[%c0_80, %c0_81, %c0_82, %c0_83] : memref<1x3x4x128xf32, #tpu.memory_space<vmem>>, vector<1x3x4x128xf32>
      tpu.vector_store %arg5[%c0_80, %c0_81, %c0_82, %c0_83], %127 {strides = array<i32>} : memref<1x3x4x128xf32, #tpu.memory_space<vmem>>, vector<1x3x4x128xf32>,
    } else {
    }
    %c0 = arith.constant 0 : index
    %c0_1 = arith.constant 0 : index
    %c0_2 = arith.constant 0 : index
    %c0_3 = arith.constant 0 : index
    %3 = vector.load %arg4[%c0, %c0_1, %c0_2, %c0_3] : memref<1x1x2x128xi8, #tpu.memory_space<vmem>>, vector<1x1x2x128xi8>
    %4 = vector.shape_cast %3 : vector<1x1x2x128xi8> to vector<2x128xi8>
    %5 = arith.extsi %4 : vector<2x128xi8> to vector<2x128xi32>
    %c0_4 = arith.constant 0 : index
    %c0_5 = arith.constant 0 : index
    %c0_6 = arith.constant 0 : index
    %c0_7 = arith.constant 0 : index
    %6 = vector.load %arg3[%c0_4, %c0_5, %c0_6, %c0_7] : memref<1x4x2x128xf32, #tpu.memory_space<vmem>>, vector<1x1x2x128xf32>
    %7 = vector.shape_cast %6 : vector<1x1x2x128xf32> to vector<2x128xf32>
    %c0_8 = arith.constant 0 : index
    %c1 = arith.constant 1 : index
    %c0_9 = arith.constant 0 : index
    %c0_10 = arith.constant 0 : index
    %8 = vector.load %arg3[%c0_8, %c1, %c0_9, %c0_10] : memref<1x4x2x128xf32, #tpu.memory_space<vmem>>, vector<1x1x2x128xf32>
    %9 = vector.shape_cast %8 : vector<1x1x2x128xf32> to vector<2x128xf32>
    %10 = arith.maximumf %7, %9 : vector<2x128xf32>
    %c0_11 = arith.constant 0 : index
    %c2 = arith.constant 2 : index
    %c0_12 = arith.constant 0 : index
    %c0_13 = arith.constant 0 : index
    %11 = vector.load %arg3[%c0_11, %c2, %c0_12, %c0_13] : memref<1x4x2x128xf32, #tpu.memory_space<vmem>>, vector<1x1x2x128xf32>
    %12 = vector.shape_cast %11 : vector<1x1x2x128xf32> to vector<2x128xf32>
    %13 = arith.maximumf %10, %12 : vector<2x128xf32>
    %c0_14 = arith.constant 0 : index
    %c3 = arith.constant 3 : index
    %c0_15 = arith.constant 0 : index
    %c0_16 = arith.constant 0 : index
    %14 = vector.load %arg3[%c0_14, %c3, %c0_15, %c0_16] : memref<1x4x2x128xf32, #tpu.memory_space<vmem>>, vector<1x1x2x128xf32>
    %15 = vector.shape_cast %14 : vector<1x1x2x128xf32> to vector<2x128xf32>
    %16 = arith.maximumf %13, %15 : vector<2x128xf32>
    %cst = arith.constant 0.000000e+00 : f32
    %17 = vector.broadcast %cst : f32 to vector<2x128xf32>
    %cst_17 = arith.constant 1.000000e+00 : f32
    %18 = vector.broadcast %cst_17 : f32 to vector<2x128xf32>
    %c0_18 = arith.constant 0 : index
    %c0_19 = arith.constant 0 : index
    %c0_20 = arith.constant 0 : index
    %c0_21 = arith.constant 0 : index
    %19 = vector.load %arg3[%c0_18, %c0_19, %c0_20, %c0_21] : memref<1x4x2x128xf32, #tpu.memory_space<vmem>>, vector<1x1x2x128xf32>
    %20 = vector.shape_cast %19 : vector<1x1x2x128xf32> to vector<2x128xf32>
    %21 = arith.subf %20, %16 : vector<2x128xf32>
    %22 = math.exp %21 : vector<2x128xf32>
    %c0_i32_22 = arith.constant 0 : i32
    %23 = vector.broadcast %c0_i32_22 : i32 to vector<2x128xi32>
    %24 = arith.cmpi eq, %5, %23 : vector<2x128xi32>
    %25 = arith.select %24, %20, %17 : vector<2x128xi1>, vector<2x128xf32>
    %c0_23 = arith.constant 0 : index
    %c1_24 = arith.constant 1 : index
    %c0_25 = arith.constant 0 : index
    %c0_26 = arith.constant 0 : index
    %26 = vector.load %arg3[%c0_23, %c1_24, %c0_25, %c0_26] : memref<1x4x2x128xf32, #tpu.memory_space<vmem>>, vector<1x1x2x128xf32>
    %27 = vector.shape_cast %26 : vector<1x1x2x128xf32> to vector<2x128xf32>
    %28 = arith.subf %27, %16 : vector<2x128xf32>
    %29 = math.exp %28 : vector<2x128xf32>
    %30 = arith.addf %22, %29 : vector<2x128xf32>
    %c1_i32 = arith.constant 1 : i32
    %31 = vector.broadcast %c1_i32 : i32 to vector<2x128xi32>
    %32 = arith.cmpi eq, %5, %31 : vector<2x128xi32>
    %33 = arith.select %32, %27, %25 : vector<2x128xi1>, vector<2x128xf32>
    %c0_27 = arith.constant 0 : index
    %c2_28 = arith.constant 2 : index
    %c0_29 = arith.constant 0 : index
    %c0_30 = arith.constant 0 : index
    %34 = vector.load %arg3[%c0_27, %c2_28, %c0_29, %c0_30] : memref<1x4x2x128xf32, #tpu.memory_space<vmem>>, vector<1x1x2x128xf32>
    %35 = vector.shape_cast %34 : vector<1x1x2x128xf32> to vector<2x128xf32>
    %36 = arith.subf %35, %16 : vector<2x128xf32>
    %37 = math.exp %36 : vector<2x128xf32>
    %38 = arith.addf %30, %37 : vector<2x128xf32>
    %c2_i32 = arith.constant 2 : i32
    %39 = vector.broadcast %c2_i32 : i32 to vector<2x128xi32>
    %40 = arith.cmpi eq, %5, %39 : vector<2x128xi32>
    %41 = arith.select %40, %35, %33 : vector<2x128xi1>, vector<2x128xf32>
    %c0_31 = arith.constant 0 : index
    %c3_32 = arith.constant 3 : index
    %c0_33 = arith.constant 0 : index
    %c0_34 = arith.constant 0 : index
    %42 = vector.load %arg3[%c0_31, %c3_32, %c0_33, %c0_34] : memref<1x4x2x128xf32, #tpu.memory_space<vmem>>, vector<1x1x2x128xf32>
    %43 = vector.shape_cast %42 : vector<1x1x2x128xf32> to vector<2x128xf32>
    %44 = arith.subf %43, %16 : vector<2x128xf32>
    %45 = math.exp %44 : vector<2x128xf32>
    %46 = arith.addf %38, %45 : vector<2x128xf32>
    %c3_i32 = arith.constant 3 : i32
    %47 = vector.broadcast %c3_i32 : i32 to vector<2x128xi32>
    %48 = arith.cmpi eq, %5, %47 : vector<2x128xi32>
    %49 = arith.select %48, %43, %41 : vector<2x128xi1>, vector<2x128xf32>
    %50 = tpu.reciprocal %46 {approx = true} : vector<2x128xf32> -> vector<2x128xf32>
    %51 = arith.mulf %46, %50 : vector<2x128xf32>
    %cst_35 = arith.constant 2.000000e+00 : f32
    %52 = vector.broadcast %cst_35 : f32 to vector<2x128xf32>
    %53 = arith.subf %52, %51 : vector<2x128xf32>
    %54 = arith.mulf %50, %53 : vector<2x128xf32>
    %55 = math.log %46 : vector<2x128xf32>
    %56 = arith.addf %16, %55 : vector<2x128xf32>
    %c0_i32_36 = arith.constant 0 : i32
    %57 = vector.broadcast %c0_i32_36 : i32 to vector<2x128xi32>
    %58 = arith.cmpi eq, %5, %57 : vector<2x128xi32>
    %59 = arith.mulf %22, %54 : vector<2x128xf32>
    %60 = arith.select %58, %59, %17 : vector<2x128xi1>, vector<2x128xf32>
    %cst_37 = arith.constant dense<0.000000e+00> : vector<128xf32>
    %61 = vector.multi_reduction <add>, %60, %cst_37 [0] : vector<2x128xf32> to vector<128xf32>
    %62 = vector.shape_cast %61 : vector<128xf32> to vector<1x128xf32>
    %cst_38 = arith.constant dense<0.000000e+00> : vector<128xf32>
    %63 = vector.multi_reduction <add>, %59, %cst_38 [0] : vector<2x128xf32> to vector<128xf32>
    %64 = vector.shape_cast %63 : vector<128xf32> to vector<1x128xf32>
    %65 = arith.select %58, %18, %17 : vector<2x128xi1>, vector<2x128xf32>
    %cst_39 = arith.constant dense<0.000000e+00> : vector<128xf32>
    %66 = vector.multi_reduction <add>, %65, %cst_39 [0] : vector<2x128xf32> to vector<128xf32>
    %67 = vector.shape_cast %66 : vector<128xf32> to vector<1x128xf32>
    %c1_i32_40 = arith.constant 1 : i32
    %68 = vector.broadcast %c1_i32_40 : i32 to vector<2x128xi32>
    %69 = arith.cmpi eq, %5, %68 : vector<2x128xi32>
    %70 = arith.mulf %29, %54 : vector<2x128xf32>
    %71 = arith.select %69, %70, %17 : vector<2x128xi1>, vector<2x128xf32>
    %cst_41 = arith.constant dense<0.000000e+00> : vector<128xf32>
    %72 = vector.multi_reduction <add>, %71, %cst_41 [0] : vector<2x128xf32> to vector<128xf32>
    %73 = vector.shape_cast %72 : vector<128xf32> to vector<1x128xf32>
    %cst_42 = arith.constant dense<0.000000e+00> : vector<128xf32>
    %74 = vector.multi_reduction <add>, %70, %cst_42 [0] : vector<2x128xf32> to vector<128xf32>
    %75 = vector.shape_cast %74 : vector<128xf32> to vector<1x128xf32>
    %76 = arith.select %69, %18, %17 : vector<2x128xi1>, vector<2x128xf32>
    %cst_43 = arith.constant dense<0.000000e+00> : vector<128xf32>
    %77 = vector.multi_reduction <add>, %76, %cst_43 [0] : vector<2x128xf32> to vector<128xf32>
    %78 = vector.shape_cast %77 : vector<128xf32> to vector<1x128xf32>
    %c2_i32_44 = arith.constant 2 : i32
    %79 = vector.broadcast %c2_i32_44 : i32 to vector<2x128xi32>
    %80 = arith.cmpi eq, %5, %79 : vector<2x128xi32>
    %81 = arith.mulf %37, %54 : vector<2x128xf32>
    %82 = arith.select %80, %81, %17 : vector<2x128xi1>, vector<2x128xf32>
    %cst_45 = arith.constant dense<0.000000e+00> : vector<128xf32>
    %83 = vector.multi_reduction <add>, %82, %cst_45 [0] : vector<2x128xf32> to vector<128xf32>
    %84 = vector.shape_cast %83 : vector<128xf32> to vector<1x128xf32>
    %cst_46 = arith.constant dense<0.000000e+00> : vector<128xf32>
    %85 = vector.multi_reduction <add>, %81, %cst_46 [0] : vector<2x128xf32> to vector<128xf32>
    %86 = vector.shape_cast %85 : vector<128xf32> to vector<1x128xf32>
    %87 = arith.select %80, %18, %17 : vector<2x128xi1>, vector<2x128xf32>
    %cst_47 = arith.constant dense<0.000000e+00> : vector<128xf32>
    %88 = vector.multi_reduction <add>, %87, %cst_47 [0] : vector<2x128xf32> to vector<128xf32>
    %89 = vector.shape_cast %88 : vector<128xf32> to vector<1x128xf32>
    %c3_i32_48 = arith.constant 3 : i32
    %90 = vector.broadcast %c3_i32_48 : i32 to vector<2x128xi32>
    %91 = arith.cmpi eq, %5, %90 : vector<2x128xi32>
    %92 = arith.mulf %45, %54 : vector<2x128xf32>
    %93 = arith.select %91, %92, %17 : vector<2x128xi1>, vector<2x128xf32>
    %cst_49 = arith.constant dense<0.000000e+00> : vector<128xf32>
    %94 = vector.multi_reduction <add>, %93, %cst_49 [0] : vector<2x128xf32> to vector<128xf32>
    %95 = vector.shape_cast %94 : vector<128xf32> to vector<1x128xf32>
    %cst_50 = arith.constant dense<0.000000e+00> : vector<128xf32>
    %96 = vector.multi_reduction <add>, %92, %cst_50 [0] : vector<2x128xf32> to vector<128xf32>
    %97 = vector.shape_cast %96 : vector<128xf32> to vector<1x128xf32>
    %98 = arith.select %91, %18, %17 : vector<2x128xi1>, vector<2x128xf32>
    %cst_51 = arith.constant dense<0.000000e+00> : vector<128xf32>
    %99 = vector.multi_reduction <add>, %98, %cst_51 [0] : vector<2x128xf32> to vector<128xf32>
    %100 = vector.shape_cast %99 : vector<128xf32> to vector<1x128xf32>
    %c0_52 = arith.constant 0 : index
    %c0_53 = arith.constant 0 : index
    %c0_54 = arith.constant 0 : index
    %c0_55 = arith.constant 0 : index
    %101 = vector.load %arg5[%c0_52, %c0_53, %c0_54, %c0_55] : memref<1x3x4x128xf32, #tpu.memory_space<vmem>>, vector<1x1x4x128xf32>
    %102 = vector.shape_cast %101 : vector<1x1x4x128xf32> to vector<4x128xf32>
    %103 = tpu.concatenate %62, %73, %84, %95 in 0 : vector<1x128xf32>, vector<1x128xf32>, vector<1x128xf32>, vector<1x128xf32> -> vector<4x128xf32>
    %104 = arith.addf %102, %103 : vector<4x128xf32>
    %c0_56 = arith.constant 0 : index
    %c0_57 = arith.constant 0 : index
    %c0_58 = arith.constant 0 : index
    %c0_59 = arith.constant 0 : index
    %105 = vector.load %arg5[%c0_56, %c0_57, %c0_58, %c0_59] : memref<1x3x4x128xf32, #tpu.memory_space<vmem>>, vector<1x1x4x128xf32>
    %106 = vector.shape_cast %105 : vector<1x1x4x128xf32> to vector<4x128xf32>
    %107 = vector.shape_cast %104 : vector<4x128xf32> to vector<1x1x4x128xf32>
    tpu.vector_store %arg5[%c0_56, %c0_57, %c0_58, %c0_59], %107 {strides = array<i32>} : memref<1x3x4x128xf32, #tpu.memory_space<vmem>>, vector<1x1x4x128xf32>,
    %c0_60 = arith.constant 0 : index
    %c1_61 = arith.constant 1 : index
    %c0_62 = arith.constant 0 : index
    %c0_63 = arith.constant 0 : index
    %108 = vector.load %arg5[%c0_60, %c1_61, %c0_62, %c0_63] : memref<1x3x4x128xf32, #tpu.memory_space<vmem>>, vector<1x1x4x128xf32>
    %109 = vector.shape_cast %108 : vector<1x1x4x128xf32> to vector<4x128xf32>
    %110 = tpu.concatenate %64, %75, %86, %97 in 0 : vector<1x128xf32>, vector<1x128xf32>, vector<1x128xf32>, vector<1x128xf32> -> vector<4x128xf32>
    %111 = arith.addf %109, %110 : vector<4x128xf32>
    %c0_64 = arith.constant 0 : index
    %c1_65 = arith.constant 1 : index
    %c0_66 = arith.constant 0 : index
    %c0_67 = arith.constant 0 : index
    %112 = vector.load %arg5[%c0_64, %c1_65, %c0_66, %c0_67] : memref<1x3x4x128xf32, #tpu.memory_space<vmem>>, vector<1x1x4x128xf32>
    %113 = vector.shape_cast %112 : vector<1x1x4x128xf32> to vector<4x128xf32>
    %114 = vector.shape_cast %111 : vector<4x128xf32> to vector<1x1x4x128xf32>
    tpu.vector_store %arg5[%c0_64, %c1_65, %c0_66, %c0_67], %114 {strides = array<i32>} : memref<1x3x4x128xf32, #tpu.memory_space<vmem>>, vector<1x1x4x128xf32>,
    %c0_68 = arith.constant 0 : index
    %c2_69 = arith.constant 2 : index
    %c0_70 = arith.constant 0 : index
    %c0_71 = arith.constant 0 : index
    %115 = vector.load %arg5[%c0_68, %c2_69, %c0_70, %c0_71] : memref<1x3x4x128xf32, #tpu.memory_space<vmem>>, vector<1x1x4x128xf32>
    %116 = vector.shape_cast %115 : vector<1x1x4x128xf32> to vector<4x128xf32>
    %117 = tpu.concatenate %67, %78, %89, %100 in 0 : vector<1x128xf32>, vector<1x128xf32>, vector<1x128xf32>, vector<1x128xf32> -> vector<4x128xf32>
    %118 = arith.addf %116, %117 : vector<4x128xf32>
    %c0_72 = arith.constant 0 : index
    %c2_73 = arith.constant 2 : index
    %c0_74 = arith.constant 0 : index
    %c0_75 = arith.constant 0 : index
    %119 = vector.load %arg5[%c0_72, %c2_73, %c0_74, %c0_75] : memref<1x3x4x128xf32, #tpu.memory_space<vmem>>, vector<1x1x4x128xf32>
    %120 = vector.shape_cast %119 : vector<1x1x4x128xf32> to vector<4x128xf32>
    %121 = vector.shape_cast %118 : vector<4x128xf32> to vector<1x1x4x128xf32>
    tpu.vector_store %arg5[%c0_72, %c2_73, %c0_74, %c0_75], %121 {strides = array<i32>} : memref<1x3x4x128xf32, #tpu.memory_space<vmem>>, vector<1x1x4x128xf32>,
    %122 = arith.subf %56, %49 : vector<2x128xf32>
    %123 = arith.truncf %122 : vector<2x128xf32> to vector<2x128xbf16>
    %c0_76 = arith.constant 0 : index
    %c0_77 = arith.constant 0 : index
    %c0_78 = arith.constant 0 : index
    %124 = vector.load %arg6[%c0_76, %c0_77, %c0_78] : memref<1x2x128xbf16, #tpu.memory_space<vmem>>, vector<1x2x128xbf16>
    %125 = vector.shape_cast %124 : vector<1x2x128xbf16> to vector<2x128xbf16>
    %126 = vector.shape_cast %123 : vector<2x128xbf16> to vector<1x2x128xbf16>
    tpu.vector_store %arg6[%c0_76, %c0_77, %c0_78], %126 {strides = array<i32>} : memref<1x2x128xbf16, #tpu.memory_space<vmem>>, vector<1x2x128xbf16>,
    return
  }
  func.func @transform_0(%arg0: i32, %arg1: i32, %arg2: i32) -> (i32, i32, i32, i32) {
    %c1_i32 = arith.constant 1 : i32
    %0 = arith.muli %arg1, %c1_i32 : i32
    %1 = arith.addi %0, %arg2 : i32
    %c0_i32 = arith.constant 0 : i32
    %c0_i32_0 = arith.constant 0 : i32
    %c0_i32_1 = arith.constant 0 : i32
    return %arg0, %c0_i32, %1, %c0_i32_0 : i32, i32, i32, i32
  }
  func.func @transform_1(%arg0: i32, %arg1: i32, %arg2: i32) -> (i32, i32, i32, i32) {
    %c1_i32 = arith.constant 1 : i32
    %0 = arith.muli %arg1, %c1_i32 : i32
    %1 = arith.addi %0, %arg2 : i32
    %c0_i32 = arith.constant 0 : i32
    %c0_i32_0 = arith.constant 0 : i32
    %c0_i32_1 = arith.constant 0 : i32
    return %arg0, %c0_i32, %1, %c0_i32_0 : i32, i32, i32, i32
  }
  func.func @transform_2(%arg0: i32, %arg1: i32, %arg2: i32) -> (i32, i32, i32, i32) {
    %c1_i32 = arith.constant 1 : i32
    %0 = arith.muli %arg0, %c1_i32 : i32
    %1 = arith.addi %0, %arg1 : i32
    %c0_i32 = arith.constant 0 : i32
    %c0_i32_0 = arith.constant 0 : i32
    %c0_i32_1 = arith.constant 0 : i32
    %c0_i32_2 = arith.constant 0 : i32
    return %1, %c0_i32, %c0_i32_0, %c0_i32_1 : i32, i32, i32, i32
  }
  func.func @transform_3(%arg0: i32, %arg1: i32, %arg2: i32) -> (i32, i32, i32) {
    %c1_i32 = arith.constant 1 : i32
    %0 = arith.muli %arg1, %c1_i32 : i32
    %1 = arith.addi %0, %arg2 : i32
    %c0_i32 = arith.constant 0 : i32
    %c0_i32_0 = arith.constant 0 : i32
    return %arg0, %1, %c0_i32 : i32, i32, i32
  }
}

</mosaic_0001>

<bundles_post_ra>
// kernel: tpu_custom_call.1
= control target key start
LH: loop header
LB: loop body
LE: loop exit
PB: predicated region body
PF: predicated region fallthrough
CT: control target
= control target key end

     0   :  { %9 = vsyncpa [#allocation3], 0  ;;  %s1183_s0 = inlined_call_operand.hbm [shape: f32[2,4,2,128], index: 0, kind: input, shape index: {}]   ;;  %s1184_s1 = inlined_call_operand.vmem [shape: s8[2,1,2,128], index: 1, kind: input, shape index: {}]   ;;  %s1185_s2 = inlined_call_operand.hbm [shape: f32[2,3,4,128], index: 2, kind: output, shape index: {0}]   ;;  %s1186_s3 = inlined_call_operand.hbm [shape: bf16[2,2,128], index: 3, kind: output, shape index: {1}]  }
   0x1   :  { %11 = vsyncpa [#allocation3 + $0x1], 0 }
   0x2   :  { %12 = vsyncpa [#allocation4], 0 }
   0x3   :  { %14 = vsyncpa [#allocation4 + $0x1], 0 }
   0x4   :  { %15 = vsyncpa [#allocation7], 0 }
   0x5   :  { %17 = vsyncpa [#allocation7 + $0x1], 0  ;;  %s881_s12 = smov 0   ;;  %s883_s13 = smov 0  }
   0x6   :  { %s885_s14 = smov 0   ;;  %s887_s15 = smov 0  }
   0x7   :  { %s889_s16 = smov 0   ;;  %s891_s17 = smov 0  }
   0x8 LB: > { %s600_s18 = sadd.s32 4294967295, %s851_s17   ;;  %s601_s19 = sadd.s32 4294967294, %s851_s17   ;;  %s851_s17 = sphi %s891_s17, %s23_s17   ;;  %s847_s16 = sphi %s889_s16, %s1201_s16   ;;  %s843_s15 = sphi %s887_s15, %s1200_s15   ;;  %s839_s14 = sphi %s885_s14, %s1199_s14   ;;  %s835_s13 = sphi %s883_s13, %s1198_s13   ;;  %s831_s12 = sphi %s881_s12, %s1197_s12  }
   0x9   : > { %s42_s20 = sadd.s32 1, %s847_s16  ;;  %s53_s21 = sadd.s32 1, %s839_s14 }
   0xa   : > { %p44_p0 = scmp.ge.s32.totalorder %s42_s20, 2  ;;  %p60_p1 = scmp.ne.s32.totalorder %s839_s14, %s835_s13 }
   0xb   : > { %p61_p2 = scmp.eq.s32.totalorder %s851_s17, 0  ;;  %p66_p3 = scmp.ne.s32.totalorder %s835_s13, %s831_s12 }
   0xc   : > { %s1203_s20 = smov (%p44_p0, %s42_s20), 0  ;;  %p67_p5 = scmp.eq.s32.totalorder %s600_s18, 0 }
   0xd   : > { %p922_p4 = por %p61_p2, %p60_p1  ;;  %s48_s23 = ssub.s32 %s847_s16, %s1203_s20 }
   0xe   : > { %p122_p6 = scmp.eq.s32.totalorder %s600_s18, 1  ;;  %p51_p7 = scmp.eq.s32.totalorder %s48_s23, 0 }
   0xf   : > { %p928_p8 = por %p67_p5, %p66_p3  ;;  %p128_p10 = scmp.eq.s32.totalorder %s601_s19, 1 }
  0x10   : > { %p932_p9 = por %p122_p6, %p60_p1  ;;  %p640_p13 = scmp.lt.s32.totalorder %s851_s17, 2 }
  0x11   : > { %s937_s26 = scalar_select %p51_p7, %s839_s14, %s53_s21  }
  0x12   : > { %s1190_s25 = scalar_select %p932_p9, 1, 0 }
  0x13   : > { %p939_p11 = por %p128_p10, %p66_p3  ;;  %s178_s28 = sand.u32 1, %s839_s14  }
  0x14   : > { %s604_s29 = sshll.u32 %s178_s28, 3  ;;  %s620_s30 = sshll.u32 %s847_s16, 7 }
  0x15   : > { %s1191_s27 = scalar_select %p939_p11, 1, 0 }
  0x16   : > { %s950_s6 = scalar_lea.hbm %s1183_s0, %s620_s30  ;;  %s182_s7 = scalar_lea.vmem [#allocation2], %s604_s29 }
  0x17   : > { %s191_s8 = sshll.u32 %s182_s7, 4  ;;  %p956_p0 = pnand %p640_p13, %p922_p4  ;;  %s952_s8 = int_to_ptr.vmem [resolvable:$true] %s191_s8 }
  0x18   : > { %s961_s10 = scalar_lea.sflag [#allocation3], %s178_s28  ;;  %s707_s11 = scalar_lea.hbm %s950_s6, 128 }
  0x19   : > { %p708_p2 = scmp.ne.s32.totalorder %s950_s6, %s707_s11  ;;  %p709_p3 = pneg %p956_p0 }
  0x1a   : > { %s712_s21 = scalar_lea.hbm %s1183_s0, 256  ;;  %p713_p4 = scmp.lt.u32.totalorder %s950_s6, %s1183_s0 }
  0x1b   : > { %p710_p5 = pnand %p709_p3, %p708_p2  ;;  %p714_p7 = scmp.lt.u32.totalorder %s712_s21, %s707_s11 }
  0x1c   : > { %p716_p13 = scmp.lt.u32.totalorder %s707_s11, %s950_s6 }
  0x1d   : > { %p711_p6 = pneg %p710_p5  ;;  %p715_p10 = por %p714_p7, %p713_p4 }
  0x1f   : > { %p717_p12 = por %p716_p13, %p715_p10 }
  0x21   : > { %p718_p1 = pnand %p717_p12, %p711_p6 }
  0x23   : > { %721 = shalt.err (!%p718_p1)
}
  0x24   : > { %s722_s28 = scalar_lea.vmem %s952_s8, 128  ;;  %s853_s29 = smov [#allocation2]  }
  0x25   : > { %p723_p2 = scmp.ne.s32.totalorder %s952_s8, %s722_s28  ;;  %s727_s30 = sshll.u32 %s853_s29, 4  ;;  %s728_s30 = int_to_ptr.vmem [resolvable:$false] %s727_s30 }
  0x26   : > { %s729_s4 = scalar_lea.vmem %s728_s30, 256  ;;  %p730_p9 = scmp.lt.s32.totalorder %s952_s8, %s728_s30 }
  0x27   : > { %p725_p5 = pnand %p723_p2, %p709_p3  ;;  %p731_p4 = scmp.lt.s32.totalorder %s729_s4, %s722_s28 }
  0x29   : > { %p726_p11 = pneg %p725_p5  ;;  %p732_p7 = por %p731_p4, %p730_p9 }
  0x2b   : > { %p733_p10 = pnand %p732_p7, %p726_p11 }
  0x2d   : > { %736 = shalt.err (!%p733_p10)
}
  0x2e   : > { %s854_s5 = smov 32   ;;  %s855_s7 = smov 2  }
  0x2f   : > { %632 = dma.hbm_to_vmem [thread:$0]  (!%p956_p0), %s950_s6, 128, %s952_s8, %s961_s10, %s854_s5, %s854_s5, %s855_s7  }
  0x30   : > { %p210_p12 = scmp.lt.s32.totalorder %s851_s17, 3  ;;  %p1193_p1 = scmp.ge.s32.totalorder %s851_s17, 1 }
  0x32   : > { %p211_p3 = pnand %p1193_p1, %p210_p12 }
  0x33   : > { %s993_s11 = sand.u32 (!%p211_p3), 1, %s835_s13  }
  0x34   : > { %214 = sbr.rel (%p211_p3) target bundleno = 160 (0xa0), region = 28  ;;  %s608_s18 = sshll.u32 (!%p211_p3), %s993_s11, 3 }
  0x35   : > { %s217_s19 = scalar_lea.sflag (!%p211_p3), [#allocation3], %s993_s11  ;;  %s220_s21 = scalar_lea.vmem (!%p211_p3), [#allocation2], %s608_s18 }
  0x3b   : > { %818 = dma.done.wait (%p928_p8), %s217_s19, 128  }
  0x3c   : > { %820 = vsyncadd (%p928_p8), %s217_s19, 4294967168  ;;  %s621_s6 = smul.u32 12, %s993_s11  ;;  %p256_p9 = scmp.lt.s32.totalorder %s843_s15, 1  ;;  %v856_v0 = vmov 0.0   ;;  %v1012_v2 = vld [vmem:[%s220_s21] sm:$0x3] }
  0x3d   : > { %v1014_v3 = vld [vmem:[%s220_s21 + $0x2] sm:$0x3]  ;;  %v1020_v6 = vld [vmem:[%s220_s21 + $0x4] sm:$0x3]  ;;  %v1022_v7 = vld [vmem:[%s220_s21 + $0x6] sm:$0x3] }
  0x3e   : > { %s1003_s8 = scalar_lea.vmem [#allocation5], %s621_s6  ;;  %v277_v5 = vmax.f32 %v1012_v2, %v1014_v3  ;;  %vm316_vm0 = vcmask 1041408   ;;  %vm412_vm5 = vcmask 1040384   ;;  %vm415_vm6 = vcmask 1042432   ;;  %s253_s23 = scalar_lea.vmem [#allocation6], %s993_s11 }
  0x3f   : > { %269 = vst [vmem:[%s1003_s8] sm:$0xf] %v856_v0  ;;  %270 = vst [vmem:[%s1003_s8 + $0x4] sm:$0xf] %v856_v0  ;;  %s257_s9 = scalar_select %p256_p9, %s843_s15, 1 }
  0x40   : > { %271 = vst [vmem:[%s1003_s8 + $0x8] sm:$0xf] %v856_v0  ;;  %v280_v8 = vmax.f32 %v277_v5, %v1020_v6  ;;  %s473_s28 = sshll.u32 %s253_s23, 4  ;;  %s617_s29 = sshll.u32 %s843_s15, 4  ;;  %s1072_s28 = int_to_ptr.vmem [resolvable:$true] %s473_s28 }
  0x41   : > { %s261_s24 = scalar_lea.vmem %s1184_s1, %s257_s9  ;;  %s1077_s5 = scalar_lea.hbm %s1186_s3, %s617_s29 }
  0x42   : > { %v272_v1 = vld [vmem:[%s261_s24] sm:$0x1]  ;;  %v1036_v12 = vmax.f32 %v280_v8, %v1022_v7  ;;  %s442_s7 = scalar_lea.sflag [#allocation7], %s993_s11  ;;  %s737_s18 = scalar_lea.vmem %s1072_s28, 16 }
  0x43   : > { %v1016_v4 = vunpack.c.0.s8 %v272_v1  ;;  %p738_p8 = scmp.ne.s32.totalorder %s1072_s28, %s737_s18  ;;  %p1194_p11 = scmp.ne.s32.totalorder %s1190_s25, 0 }
  0x44   : > { %v284_v20 = vsub.f32 %v1012_v2, %v1036_v12  ;;  %v289_v21 = vsub.f32 %v1014_v3, %v1036_v12  ;;  %v295_v22 = vsub.f32 %v1020_v6, %v1036_v12  ;;  %v301_v23 = vsub.f32 %v1022_v7, %v1036_v12  ;;  %s857_s19 = smov [#allocation6]  }
  0x45   : > { %vm287_vm1 = vcmp.eq.s32.totalorder %v1016_v4, 0  ;;  %vm293_vm2 = vcmp.eq.s32.totalorder %v1016_v4, 1  ;;  %vm299_vm3 = vcmp.eq.s32.totalorder %v1016_v4, 2  ;;  %vm305_vm4 = vcmp.eq.s32.totalorder %v1016_v4, 3  ;;  %p739_p0 = pnand %p738_p8, %p1194_p11  ;;  %s741_s21 = sshll.u32 %s857_s19, 4  ;;  %s742_s21 = int_to_ptr.vmem [resolvable:$false] %s741_s21 }
  0x46   : > { %v331_v9 = vsel %vm287_vm1, 1.0, %v856_v0  ;;  %v355_v10 = vsel %vm293_vm2, 1.0, %v856_v0  ;;  %v379_v11 = vsel %vm299_vm3, 1.0, %v856_v0  ;;  %v403_v19 = vsel %vm305_vm4, 1.0, %v856_v0  ;;  %s743_s6 = scalar_lea.vmem %s742_s21, 32  ;;  %p744_p13 = scmp.lt.s32.totalorder %s1072_s28, %s742_s21 }
  0x47   : > { %v332_v13 = vsel %vm316_vm0, %v331_v9, 0.0  ;;  %v356_v14 = vsel %vm316_vm0, %v355_v10, 0.0  ;;  %v380_v15 = vsel %vm316_vm0, %v379_v11, 0.0  ;;  %v404_v27 = vsel %vm316_vm0, %v403_v19, 0.0  ;;  %v614_v53 = vld [vmem:[%s1003_s8 + $0x8] sm:$0xf]  ;;  %p740_p6 = pneg %p739_p0  ;;  %p745_p2 = scmp.lt.s32.totalorder %s743_s6, %s737_s18 }
  0x48   : > { %v333_v16 = vrot.slane %v332_v13, 4  ;;  %v357_v17 = vrot.slane %v356_v14, 4  ;;  %v381_v18 = vrot.slane %v380_v15, 4  ;;  %v285_v28 = vmul.f32 1.442695, %v284_v20 }
  0x49   : > { %v290_v29 = vmul.f32 1.442695, %v289_v21  ;;  %v296_v30 = vmul.f32 1.442695, %v295_v22  ;;  %v302_v31 = vmul.f32 1.442695, %v301_v23  ;;  %p746_p5 = por %p745_p2, %p744_p13 }
  0x4a   : > { %v334_v24 = vadd.f32 %v333_v16, %v332_v13  ;;  %v358_v25 = vadd.f32 %v357_v17, %v356_v14  ;;  %v382_v26 = vadd.f32 %v381_v18, %v380_v15  ;;  %695 = vpow2.f32 %v285_v28 }
  0x4b   : > { %v405_v35 = vrot.slane %v404_v27, 4  ;;  %697 = vpow2.f32 %v290_v29  ;;  %v288_v62 = vsel %vm287_vm1, %v1012_v2, 0.0  ;;  %p747_p4 = pnand %p746_p5, %p740_p6 }
  0x4c   : > { %v335_v32 = vrot.slane %v334_v24, 2  ;;  %v359_v33 = vrot.slane %v358_v25, 2  ;;  %v383_v34 = vrot.slane %v382_v26, 2  ;;  %699 = vpow2.f32 %v296_v30 }
  0x4d   : > { %v406_v39 = vadd.f32 %v405_v35, %v404_v27  ;;  %701 = vpow2.f32 %v302_v31  ;;  %v294_v63 = vsel %vm293_vm2, %v1014_v3, %v288_v62 }
  0x4e   : > { %v336_v36 = vadd.f32 %v335_v32, %v334_v24  ;;  %v360_v37 = vadd.f32 %v359_v33, %v358_v25  ;;  %v384_v38 = vadd.f32 %v383_v34, %v382_v26  ;;  %v300_v1 = vsel %vm299_vm3, %v1020_v6, %v294_v63 }
  0x4f   : > { %v407_v43 = vrot.slane %v406_v39, 2  ;;  %v306_v11 = vsel %vm305_vm4, %v1022_v7, %v300_v1 }
  0x50   : > { %v337_v40 = vrot.slane %v336_v36, 1  ;;  %v361_v41 = vrot.slane %v360_v37, 1  ;;  %v385_v42 = vrot.slane %v384_v38, 1 }
  0x51   : > { %v408_v47 = vadd.f32 %v407_v43, %v406_v39 }
  0x52   : > { %v338_v44 = vadd.f32 %v337_v40, %v336_v36  ;;  %v362_v45 = vadd.f32 %v361_v41, %v360_v37  ;;  %v386_v46 = vadd.f32 %v385_v42, %v384_v38 }
  0x53   : > { %v409_v49 = vrot.slane %v408_v47, 1 }
  0x54   : > { %v428_v48 = vsel %vm412_vm5, %v338_v44, %v362_v45  ;;  %v696_v51 = vpop.eup %695 }
  0x55   : > { %v429_v50 = vsel %vm316_vm0, %v428_v48, %v386_v46  ;;  %v410_v52 = vadd.f32 %v409_v49, %v408_v47  ;;  %v698_v54 = vpop.eup %697 }
  0x56   : > { %v700_v55 = vpop.eup %699  ;;  %v292_v56 = vadd.f32 %v698_v54, %v696_v51 }
  0x57   : > { %v430_v57 = vsel %vm415_vm6, %v429_v50, %v410_v52  ;;  %v702_v58 = vpop.eup %701 }
  0x58   : > { %v431_v59 = vadd.f32 %v614_v53, %v430_v57  ;;  %v298_v60 = vadd.f32 %v700_v55, %v292_v56 }
  0x5a   : > { %615 = vst [vmem:[%s1003_s8 + $0x8] sm:$0xf] %v431_v59  ;;  %v304_v61 = vadd.f32 %v702_v58, %v298_v60 }
  0x5c   : > { %703 = vrcp.f32 %v304_v61 }
  0x5d   : > { %705 = vlog2.f32 %v304_v61 }
  0x66   : > { %v704_v0 = vpop.eup %703 }
  0x67   : > { %v706_v5 = vpop.eup %705  ;;  %v308_v8 = vmul.f32 %v704_v0, %v304_v61 }
  0x68   : > { %v312_v9 = vmul.f32 0.6931472, %v706_v5 }
  0x69   : > { %v309_v10 = vsub.f32 2.0, %v308_v8 }
  0x6a   : > { %v313_v13 = vadd.f32 %v312_v9, %v1036_v12 }
  0x6b   : > { %v310_v2 = vmul.f32 %v704_v0, %v309_v10 }
  0x6c   : > { %v433_v3 = vsub.f32 %v313_v13, %v306_v11 }
  0x6d   : > { %v314_v14 = vmul.f32 %v696_v51, %v310_v2  ;;  %v339_v15 = vmul.f32 %v698_v54, %v310_v2  ;;  %v363_v16 = vmul.f32 %v700_v55, %v310_v2  ;;  %v387_v17 = vmul.f32 %v702_v58, %v310_v2 }
  0x6e   : > { %v434_v6 = vpack.c.bf16 %v433_v3, %v433_v3 }
  0x6f   : > { %v315_v7 = vsel %vm287_vm1, %v314_v14, 0.0  ;;  %v340_v12 = vsel %vm293_vm2, %v339_v15, 0.0  ;;  %v364_v18 = vsel %vm299_vm3, %v363_v16, 0.0  ;;  %v388_v19 = vsel %vm305_vm4, %v387_v17, 0.0 }
  0x70   : > { %v317_v20 = vsel %vm316_vm0, %v315_v7, 0.0  ;;  %v341_v21 = vsel %vm316_vm0, %v340_v12, 0.0  ;;  %v365_v22 = vsel %vm316_vm0, %v364_v18, 0.0  ;;  %v389_v23 = vsel %vm316_vm0, %v388_v19, 0.0  ;;  %435 = vst [vmem:[%s253_s23] sm:$0x1] %v434_v6 }
  0x71   : > { %v318_v24 = vrot.slane %v317_v20, 4  ;;  %v342_v25 = vrot.slane %v341_v21, 4  ;;  %v366_v26 = vrot.slane %v365_v22, 4  ;;  %v390_v27 = vrot.slane %v389_v23, 4 }
  0x72   : > { %750 = shalt.err (!%p747_p4)
}
  0x73   : > { %s751_s9 = scalar_lea.hbm %s1077_s5, 16  ;;  %s755_s24 = scalar_lea.hbm %s1186_s3, 32 }
  0x74   : > { %p752_p7 = scmp.ne.s32.totalorder %s1077_s5, %s751_s9  ;;  %p756_p1 = scmp.lt.u32.totalorder %s1077_s5, %s1186_s3 }
  0x75   : > { %p757_p3 = scmp.lt.u32.totalorder %s755_s24, %s751_s9  ;;  %p759_p8 = scmp.lt.u32.totalorder %s751_s9, %s1077_s5 }
  0x76   : > { %p753_p10 = pnand %p752_p7, %p1194_p11 }
  0x77   : > { %p758_p9 = por %p757_p3, %p756_p1 }
  0x78   : > { %p754_p12 = pneg %p753_p10 }
  0x79   : > { %p760_p0 = por %p759_p8, %p758_p9 }
  0x7b   : > { %p761_p6 = pnand %p760_p0, %p754_p12 }
  0x7d   : > { %764 = shalt.err (!%p761_p6)
}
  0x7e   : > { %626 = dma.vmem_to_hbm [thread:$0]  (%p1194_p11), %s1072_s28, 16, %s1077_s5, %s442_s7   ;;  %v324_v4 = vsel %vm316_vm0, %v314_v14, 0.0  ;;  %v348_v28 = vsel %vm316_vm0, %v339_v15, 0.0  ;;  %v372_v29 = vsel %vm316_vm0, %v363_v16, 0.0  ;;  %v396_v30 = vsel %vm316_vm0, %v387_v17, 0.0 }
  0x7f   : > { %v319_v31 = vadd.f32 %v318_v24, %v317_v20  ;;  %v343_v32 = vadd.f32 %v342_v25, %v341_v21  ;;  %v367_v33 = vadd.f32 %v366_v26, %v365_v22  ;;  %v391_v34 = vadd.f32 %v390_v27, %v389_v23  ;;  %v411_v13 = vld [vmem:[%s1003_s8] sm:$0xf]  ;;  %s622_s28 = smul.u32 192, %s843_s15  ;;  %s455_s30 = sshll.u32 %s1003_s8, 4  ;;  %v612_v12 = vld [vmem:[%s1003_s8 + $0x4] sm:$0xf]  ;;  %s1133_s30 = int_to_ptr.vmem [resolvable:$true] %s455_s30 }
  0x80   : > { %v325_v35 = vrot.slane %v324_v4, 4  ;;  %v349_v36 = vrot.slane %v348_v28, 4  ;;  %v373_v37 = vrot.slane %v372_v29, 4  ;;  %v397_v38 = vrot.slane %v396_v30, 4  ;;  %s437_s15 = scalar_lea.sflag [#allocation4], %s993_s11  ;;  %s765_s18 = scalar_lea.vmem %s1133_s30, 192 }
  0x81   : > { %v320_v39 = vrot.slane %v319_v31, 2  ;;  %v344_v40 = vrot.slane %v343_v32, 2  ;;  %v368_v41 = vrot.slane %v367_v33, 2  ;;  %v392_v42 = vrot.slane %v391_v34, 2  ;;  %s1131_s7 = scalar_lea.hbm %s1185_s2, %s622_s28  ;;  %p766_p13 = scmp.ne.s32.totalorder %s1133_s30, %s765_s18 }
  0x82   : > { %v326_v43 = vadd.f32 %v325_v35, %v324_v4  ;;  %v350_v44 = vadd.f32 %v349_v36, %v348_v28  ;;  %v374_v45 = vadd.f32 %v373_v37, %v372_v29  ;;  %v398_v46 = vadd.f32 %v397_v38, %v396_v30  ;;  %s858_s19 = smov [#allocation5]  }
  0x83   : > { %v321_v47 = vadd.f32 %v320_v39, %v319_v31  ;;  %v345_v48 = vadd.f32 %v344_v40, %v343_v32  ;;  %v369_v49 = vadd.f32 %v368_v41, %v367_v33  ;;  %v393_v50 = vadd.f32 %v392_v42, %v391_v34  ;;  %p767_p2 = pnand %p766_p13, %p1194_p11  ;;  %s769_s21 = sshll.u32 %s858_s19, 4  ;;  %s770_s21 = int_to_ptr.vmem [resolvable:$false] %s769_s21 }
  0x84   : > { %v327_v51 = vrot.slane %v326_v43, 2  ;;  %v351_v52 = vrot.slane %v350_v44, 2  ;;  %v375_v53 = vrot.slane %v374_v45, 2  ;;  %v399_v54 = vrot.slane %v398_v46, 2  ;;  %s771_s6 = scalar_lea.vmem %s770_s21, 384  ;;  %p772_p4 = scmp.lt.s32.totalorder %s1133_s30, %s770_s21 }
  0x85   : > { %v322_v55 = vrot.slane %v321_v47, 1  ;;  %v346_v56 = vrot.slane %v345_v48, 1  ;;  %v370_v57 = vrot.slane %v369_v49, 1  ;;  %v394_v58 = vrot.slane %v393_v50, 1  ;;  %p768_p5 = pneg %p767_p2  ;;  %p773_p7 = scmp.lt.s32.totalorder %s771_s6, %s765_s18 }
  0x86   : > { %v328_v59 = vadd.f32 %v327_v51, %v326_v43  ;;  %v352_v60 = vadd.f32 %v351_v52, %v350_v44  ;;  %v376_v61 = vadd.f32 %v375_v53, %v374_v45  ;;  %v400_v62 = vadd.f32 %v399_v54, %v398_v46 }
  0x87   : > { %v323_v63 = vadd.f32 %v322_v55, %v321_v47  ;;  %v347_v0 = vadd.f32 %v346_v56, %v345_v48  ;;  %v371_v1 = vadd.f32 %v370_v57, %v369_v49  ;;  %v395_v5 = vadd.f32 %v394_v58, %v393_v50  ;;  %p774_p10 = por %p773_p7, %p772_p4 }
  0x88   : > { %v329_v8 = vrot.slane %v328_v59, 1  ;;  %v353_v9 = vrot.slane %v352_v60, 1  ;;  %v377_v10 = vrot.slane %v376_v61, 1  ;;  %v401_v11 = vrot.slane %v400_v62, 1 }
  0x89   : > { %v413_v2 = vsel %vm412_vm5, %v323_v63, %v347_v0  ;;  %p775_p12 = pnand %p774_p10, %p768_p5 }
  0x8a   : > { %v414_v3 = vsel %vm316_vm0, %v413_v2, %v371_v1  ;;  %v330_v14 = vadd.f32 %v329_v8, %v328_v59  ;;  %v354_v15 = vadd.f32 %v353_v9, %v352_v60  ;;  %v378_v16 = vadd.f32 %v377_v10, %v376_v61 }
  0x8b   : > { %v416_v17 = vsel %vm415_vm6, %v414_v3, %v395_v5  ;;  %v402_v6 = vadd.f32 %v401_v11, %v400_v62 }
  0x8c   : > { %v417_v7 = vadd.f32 %v416_v17, %v411_v13  ;;  %v421_v18 = vsel %vm412_vm5, %v330_v14, %v354_v15 }
  0x8d   : > { %v422_v19 = vsel %vm316_vm0, %v421_v18, %v378_v16 }
  0x8e   : > { %418 = vst [vmem:[%s1003_s8] sm:$0xf] %v417_v7  ;;  %v423_v20 = vsel %vm415_vm6, %v422_v19, %v402_v6 }
  0x8f   : > { %v424_v21 = vadd.f32 %v612_v12, %v423_v20 }
  0x91   : > { %613 = vst [vmem:[%s1003_s8 + $0x4] sm:$0xf] %v424_v21 }
  0x92   : > { %778 = shalt.err (!%p775_p12)
}
  0x93   : > { %s779_s8 = scalar_lea.hbm %s1131_s7, 192  ;;  %s783_s22 = scalar_lea.hbm %s1185_s2, 384 }
  0x94   : > { %p780_p1 = scmp.ne.s32.totalorder %s1131_s7, %s779_s8  ;;  %p784_p8 = scmp.lt.u32.totalorder %s1131_s7, %s1185_s2 }
  0x95   : > { %p785_p0 = scmp.lt.u32.totalorder %s783_s22, %s779_s8  ;;  %p787_p13 = scmp.lt.u32.totalorder %s779_s8, %s1131_s7 }
  0x96   : > { %p781_p3 = pnand %p780_p1, %p1194_p11 }
  0x97   : > { %p786_p6 = por %p785_p0, %p784_p8 }
  0x98   : > { %p782_p9 = pneg %p781_p3 }
  0x99   : > { %p788_p2 = por %p787_p13, %p786_p6 }
  0x9b   : > { %p789_p5 = pnand %p788_p2, %p782_p9 }
  0x9d   : > { %792 = shalt.err (!%p789_p5)
}
  0x9e   : > { %s859_s29 = smov 64   ;;  %s860_s28 = smov 4  }
  0x9f   : > { %625 = dma.vmem_to_hbm [thread:$0]  (%p1194_p11), %s1133_s30, 192, %s1131_s7, %s437_s15, %s859_s29, %s859_s29, %s860_s28  }
  0xa0 PF: > { %s485_s4 = sand.u32 1, %s831_s12   ;;  %p1195_p4 = scmp.ne.s32.totalorder %s1191_s27, 0 }
  0xa1   : > { %p1196_p7 = scmp.ge.s32.totalorder %s851_s17, 2  ;;  %s486_s5 = scalar_lea.sflag [#allocation4], %s485_s4 }
  0xa3   : > { %p634_p10 = pnand %p1196_p7, %p1195_p4 }
  0xa5   : > { %822 = dma.done.wait (!%p634_p10), %s486_s5, 192  }
  0xa6   : > { %824 = vsyncadd (!%p634_p10), %s486_s5, 4294967104  ;;  %s495_s18 = scalar_lea.sflag [#allocation7], %s485_s4 }
  0xa7   : > { %826 = dma.done.wait (!%p634_p10), %s495_s18, 16  }
  0xa8   : > { %828 = vsyncadd (!%p634_p10), %s495_s18, 4294967280  ;;  %s23_s17 = sadd.s32 1, %s851_s17   ;;  %s1197_s12 = smov %s835_s13 }
  0xa9   : > { %p20_p12 = scmp.ge.s32.totalorder %s23_s17, 4   ;;  %s1198_s13 = smov %s839_s14 }
  0xaa   : > { %s1199_s14 = smov %s937_s26  ;;  %s1200_s15 = smov %s847_s16 }
  0xab   : > { %s1201_s16 = smov %s1203_s20  ;;  %22 = sbr.rel (!%p20_p12) target bundleno = 8 (0x8), region = 102 }
  0xb2   :  { %499 = vsyncpa [#allocation3], 1 }
  0xb3   :  { %501 = vsyncpa [#allocation3 + $0x1], 1 }
  0xb4   :  { %502 = vsyncpa [#allocation4], 1 }
  0xb5   :  { %504 = vsyncpa [#allocation4 + $0x1], 1 }
  0xb6   :  { %505 = vsyncpa [#allocation7], 1 }
  0xb7   :  { %507 = vsyncpa [#allocation7 + $0x1], 1 }

</bundles_post_ra>
